<compile_context>
chip_gen: v5e
topology: v5e:2x2
jax: 0.10.0
libtpu: 0.0.40
codegen_flags: <defaults>
</compile_context>

<pallas_src>
import math

import jax
import jax.numpy as jnp
from jax import lax
from jax.experimental import pallas as pl
from jax.experimental.pallas import tpu as pltpu


_SQRT_HALF = 1.0 / math.sqrt(2.0)


def _mlm_kernel(x_ref, wd_ref, bd_ref, gamma_ref, beta_ref, proj_ref,
                we_ref, bias_ref, out_ref, p_ref):
    # Dense -> gelu -> LayerNorm -> projection: once per row tile.  The inner
    # vocab axis (program_id(1)) revisits the same rows, so cache p in scratch.
    @pl.when(pl.program_id(1) == 0)
    def _():
        x = x_ref[...].astype(jnp.bfloat16)
        # x @ Wd^T : Wd stored (out, in) as in nn.Linear -> contract dim 1.
        h = lax.dot_general(x, wd_ref[...],
                            dimension_numbers=(((1,), (1,)), ((), ())),
                            preferred_element_type=jnp.float32)
        h = h + bd_ref[...]

        # exact gelu: 0.5 * x * (1 + erf(x / sqrt(2)))
        h = 0.5 * h * (1.0 + lax.erf(h * _SQRT_HALF))

        # LayerNorm (eps=1e-12): single-pass stats, rsqrt on the EUP.
        mean = jnp.mean(h, axis=-1, keepdims=True)
        msq = jnp.mean(h * h, axis=-1, keepdims=True)
        var = jnp.maximum(msq - mean * mean, 0.0)
        ln = (h - mean) * lax.rsqrt(var + 1e-12)
        ln = ln * gamma_ref[...] + beta_ref[...]

        # factorized projection: (TM, H) @ (H, E)
        p = jnp.dot(ln.astype(jnp.bfloat16), proj_ref[...],
                    preferred_element_type=jnp.float32)
        p_ref[...] = p.astype(jnp.bfloat16)

    # decoder: (TM, E) @ (TV, E)^T -> (TM, TV), streamed over vocab tiles.
    logits = lax.dot_general(p_ref[...], we_ref[...],
                             dimension_numbers=(((1,), (1,)), ((), ())),
                             preferred_element_type=jnp.float32)
    out_ref[...] = (logits + bias_ref[...]).astype(out_ref.dtype)


def _round_up(x, m):
    return (x + m - 1) // m * m


def projection_masked_lm(hidden_states, params, word_embeddings_weight,
                         projection_weight, *, tm=256,
                         out_dtype=jnp.float32,
                         vmem_budget_bytes=36 * 1024 * 1024):
    """hidden_states: (B, S, H) f32
       word_embeddings_weight: (V, E) f32
       projection_weight: (H, E) f32
       returns logits: (B, S, V) in out_dtype (default f32, matching the module)
    """
    B, S, H = hidden_states.shape
    V, E = word_embeddings_weight.shape
    M = B * S

    x2d = hidden_states.reshape(M, H).astype(jnp.float32)

    # Row tile: multiple of 8 (sublane), no larger than the (padded) row count.
    TM = min(tm, _round_up(M, 8))
    Mp = _round_up(M, TM)

    # Vocab padded to a lane multiple so logits stores are unmasked / lane-dense.
    Vp0 = _round_up(V, 128)
    out_bytes = jnp.dtype(out_dtype).itemsize

    # Pick the vocab tile: prefer the whole padded vocab (bf16 decoder table
    # resident in VMEM); shrink only if the double-buffered tiles would blow
    # the VMEM budget (conservative for v7x's 64 MiB).
    def _fits(tv):
        need = 2 * (TM * H * 4            # x tile (f32), double-buffered
                    + tv * E * 2          # We tile (bf16)
                    + TM * tv * out_bytes)  # out tile
        need += 2 * (H * H + H * E)       # resident bf16 dense + projection
        need += 4 * (3 * H + tv)          # biases / LN params (f32)
        need += TM * E * 2                # p scratch (bf16)
        return need <= vmem_budget_bytes

    TV = 128
    for cand in (Vp0, 16384, 8192, 4096, 2048, 1024, 512, 256, 128):
        if cand <= Vp0 and _fits(cand):
            TV = cand
            break
    Vp = _round_up(V, TV)

    # Padded / dtype-converted operands.  Weights are cast to bf16 for full-rate
    # MXU; accumulation stays f32 inside the kernel.
    # TODO(synk): in a real model, cast/pad the weights once at init instead of per call.
    x_p = jnp.pad(x2d, ((0, Mp - M), (0, 0)))
    wd = params["dense_w"].astype(jnp.bfloat16)                      # (H, H) (out, in)
    bd = params["dense_b"].reshape(1, H).astype(jnp.float32)
    gamma = params["ln_w"].reshape(1, H).astype(jnp.float32)
    beta = params["ln_b"].reshape(1, H).astype(jnp.float32)
    proj = projection_weight.astype(jnp.bfloat16)                    # (H, E)
    we = jnp.pad(word_embeddings_weight, ((0, Vp - V), (0, 0))).astype(jnp.bfloat16)
    bias = jnp.pad(params["out_bias"], (0, Vp - V)).reshape(1, Vp).astype(jnp.float32)

    grid = (Mp // TM, Vp // TV)

    out2d = pl.pallas_call(
        _mlm_kernel,
        out_shape=jax.ShapeDtypeStruct((Mp, Vp), out_dtype),
        grid=grid,
        in_specs=[
            pl.BlockSpec((TM, H), lambda i, j: (i, 0)),   # x rows
            pl.BlockSpec((H, H), lambda i, j: (0, 0)),    # dense weight (resident)
            pl.BlockSpec((1, H), lambda i, j: (0, 0)),    # dense bias
            pl.BlockSpec((1, H), lambda i, j: (0, 0)),    # LN gamma
            pl.BlockSpec((1, H), lambda i, j: (0, 0)),    # LN beta
            pl.BlockSpec((H, E), lambda i, j: (0, 0)),    # projection (resident)
            pl.BlockSpec((TV, E), lambda i, j: (j, 0)),   # word embeddings (V-tiled)
            pl.BlockSpec((1, TV), lambda i, j: (0, j)),   # output bias
        ],
        out_specs=pl.BlockSpec((TM, TV), lambda i, j: (i, j)),
        scratch_shapes=[pltpu.VMEM((TM, E), jnp.bfloat16)],
        compiler_params=pltpu.CompilerParams(
            dimension_semantics=("parallel", "arbitrary"),
            vmem_limit_bytes=48 * 1024 * 1024),
    )(x_p, wd, bd, gamma, beta, proj, we, bias)

    return out2d[:M, :V].reshape(B, S, V)


def _reference(hidden_states, params, word_embeddings_weight, projection_weight,
               matmul_dtype=jnp.float32):
    """Pure-JAX reference; matmul_dtype lets us match the kernel's bf16 operands."""
    B, S, H = hidden_states.shape
    md = matmul_dtype
    x = hidden_states.reshape(B * S, H)
    h = jnp.dot(x.astype(md), params["dense_w"].T.astype(md),
                preferred_element_type=jnp.float32) + params["dense_b"]
    h = 0.5 * h * (1.0 + lax.erf(h * _SQRT_HALF))
    mean = jnp.mean(h, axis=-1, keepdims=True)
    var = jnp.mean((h - mean) ** 2, axis=-1, keepdims=True)
    h = (h - mean) / jnp.sqrt(var + 1e-12)
    h = h * params["ln_w"] + params["ln_b"]
    p = jnp.dot(h.astype(md), projection_weight.astype(md),
                preferred_element_type=jnp.float32)
    logits = jnp.dot(p.astype(md), word_embeddings_weight.T.astype(md),
                     preferred_element_type=jnp.float32) + params["out_bias"]
    return logits.reshape(B, S, -1)


if __name__ == "__main__":
    # Small shapes consistent with the module (ALBERT-style factorized head).
    B, S, H, E, V = 2, 8, 32, 16, 64
    initializer_range = 0.02

    key = jax.random.PRNGKey(0)
    k = jax.random.split(key, 6)

    params = {
        # dense.weight = fmod(randn, initializer_range)  (shape (H, H), (out, in))
        "dense_w": jnp.fmod(jax.random.normal(k[0], (H, H), jnp.float32),
                            initializer_range),
        "dense_b": jnp.zeros((H,), jnp.float32),
        "ln_w": jnp.ones((H,), jnp.float32),
        "ln_b": jnp.zeros((H,), jnp.float32),
        "out_bias": jnp.zeros((V,), jnp.float32),  # self.bias (n_vocab,)
    }

    hidden_states = jax.random.normal(k[1], (B, S, H), jnp.float32)
    word_embeddings_weight = jax.random.normal(k[2], (V, E), jnp.float32) * 0.5
    projection_weight = jax.random.normal(k[3], (H, E), jnp.float32) * 0.5

    out = projection_masked_lm(hidden_states, params, word_embeddings_weight,
                               projection_weight)
    out = jax.block_until_ready(out)
    assert out.shape == (B, S, V)

    # Tight check vs a reference that applies the same bf16-operand / f32-accum
    # matmul precision as the kernel.
    ref_bf16 = _reference(hidden_states, params, word_embeddings_weight,
                          projection_weight, matmul_dtype=jnp.bfloat16)
    assert jnp.allclose(out, ref_bf16, atol=2e-2, rtol=2e-2), \
        "mismatch vs bf16-matched reference"

    # Loose sanity check vs the full-f32 reference (bf16 rounding error only).
    ref_f32 = _reference(hidden_states, params, word_embeddings_weight,
                         projection_weight, matmul_dtype=jnp.float32)
    assert jnp.allclose(out, ref_f32, atol=0.5, rtol=5e-2), \
        "mismatch vs f32 reference"

    print("KERNEL_OK")
</pallas_src>

<mosaic_0001>
module attributes {stable_mosaic.version = 11 : i64} {
  func.func @_mlm_kernel(%arg0: i32, %arg1: i32, %arg2: memref<16x32xf32, #tpu.memory_space<vmem>>, %arg3: memref<32x32xbf16, #tpu.memory_space<vmem>>, %arg4: memref<1x32xf32, #tpu.memory_space<vmem>>, %arg5: memref<1x32xf32, #tpu.memory_space<vmem>>, %arg6: memref<1x32xf32, #tpu.memory_space<vmem>>, %arg7: memref<32x16xbf16, #tpu.memory_space<vmem>>, %arg8: memref<128x16xbf16, #tpu.memory_space<vmem>>, %arg9: memref<1x128xf32, #tpu.memory_space<vmem>>, %arg10: memref<16x128xf32, #tpu.memory_space<vmem>>, %arg11: memref<16x16xbf16, #tpu.memory_space<vmem>>) attributes {dimension_semantics = [#tpu.dimension_semantics<parallel>, #tpu.dimension_semantics<arbitrary>], iteration_bounds = array<i64: 1, 1>, scalar_prefetch = 0 : i64, scratch_operands = 1 : i64, tpu.core_type = #tpu.core_type<tc>, window_params = [{transform_indices = @transform_0, window_bounds = array<i64: 16, 32>}, {pipeline_mode = #tpu.pipeline_mode<synchronous>, transform_indices = @transform_1, window_bounds = array<i64: 32, 32>}, {pipeline_mode = #tpu.pipeline_mode<synchronous>, transform_indices = @transform_2, window_bounds = array<i64: 1, 32>}, {pipeline_mode = #tpu.pipeline_mode<synchronous>, transform_indices = @transform_3, window_bounds = array<i64: 1, 32>}, {pipeline_mode = #tpu.pipeline_mode<synchronous>, transform_indices = @transform_4, window_bounds = array<i64: 1, 32>}, {pipeline_mode = #tpu.pipeline_mode<synchronous>, transform_indices = @transform_5, window_bounds = array<i64: 32, 16>}, {transform_indices = @transform_6, window_bounds = array<i64: 128, 16>}, {transform_indices = @transform_7, window_bounds = array<i64: 1, 128>}, {transform_indices = @transform_8, window_bounds = array<i64: 16, 128>}]} {
    %c0_i32 = arith.constant 0 : i32
    %0 = arith.cmpi eq, %arg1, %c0_i32 : i32
    %1 = arith.extui %0 : i1 to i32
    %c0_i32_0 = arith.constant 0 : i32
    %2 = arith.cmpi ne, %1, %c0_i32_0 : i32
    scf.if %2 {
      %c0_8 = arith.constant 0 : index
      %c0_9 = arith.constant 0 : index
      %10 = vector.load %arg2[%c0_8, %c0_9] : memref<16x32xf32, #tpu.memory_space<vmem>>, vector<16x32xf32>
      %11 = arith.truncf %10 : vector<16x32xf32> to vector<16x32xbf16>
      %c0_10 = arith.constant 0 : index
      %c0_11 = arith.constant 0 : index
      %12 = vector.load %arg3[%c0_10, %c0_11] : memref<32x32xbf16, #tpu.memory_space<vmem>>, vector<32x32xbf16>
      %cst_12 = arith.constant dense<0.000000e+00> : vector<16x32xf32>
      %13 = tpu.matmul %11, %12, %cst_12 {dimension_numbers = #tpu.dot_dimension_numbers<[1], [1], [0], [0], [0, 0, 1, 0], [], []>} : vector<16x32xbf16>, vector<32x32xbf16>, vector<16x32xf32> -> vector<16x32xf32>
      %c0_13 = arith.constant 0 : index
      %c0_14 = arith.constant 0 : index
      %14 = vector.load %arg4[%c0_13, %c0_14] : memref<1x32xf32, #tpu.memory_space<vmem>>, vector<1x32xf32>
      %15 = vector.broadcast %14 : vector<1x32xf32> to vector<16x32xf32>
      %16 = arith.addf %13, %15 : vector<16x32xf32>
      %cst_15 = arith.constant 5.000000e-01 : f32
      %17 = vector.broadcast %cst_15 : f32 to vector<16x32xf32>
      %18 = arith.mulf %17, %16 : vector<16x32xf32>
      %cst_16 = arith.constant 0.707106769 : f32
      %19 = vector.broadcast %cst_16 : f32 to vector<16x32xf32>
      %20 = arith.mulf %16, %19 : vector<16x32xf32>
      %21 = math.erf %20 : vector<16x32xf32>
      %cst_17 = arith.constant 1.000000e+00 : f32
      %22 = vector.broadcast %cst_17 : f32 to vector<16x32xf32>
      %23 = arith.addf %22, %21 : vector<16x32xf32>
      %24 = arith.mulf %18, %23 : vector<16x32xf32>
      %cst_18 = arith.constant dense<0.000000e+00> : vector<16xf32>
      %25 = vector.multi_reduction <add>, %24, %cst_18 [1] : vector<16x32xf32> to vector<16xf32>
      %26 = vector.shape_cast %25 : vector<16xf32> to vector<16x1xf32>
      %cst_19 = arith.constant 3.200000e+01 : f32
      %27 = vector.broadcast %cst_19 : f32 to vector<16x1xf32>
      %28 = arith.divf %26, %27 : vector<16x1xf32>
      %29 = arith.mulf %24, %24 : vector<16x32xf32>
      %cst_20 = arith.constant dense<0.000000e+00> : vector<16xf32>
      %30 = vector.multi_reduction <add>, %29, %cst_20 [1] : vector<16x32xf32> to vector<16xf32>
      %31 = vector.shape_cast %30 : vector<16xf32> to vector<16x1xf32>
      %cst_21 = arith.constant 3.200000e+01 : f32
      %32 = vector.broadcast %cst_21 : f32 to vector<16x1xf32>
      %33 = arith.divf %31, %32 : vector<16x1xf32>
      %34 = arith.mulf %28, %28 : vector<16x1xf32>
      %35 = arith.subf %33, %34 : vector<16x1xf32>
      %cst_22 = arith.constant 0.000000e+00 : f32
      %36 = vector.broadcast %cst_22 : f32 to vector<16x1xf32>
      %37 = arith.maximumf %35, %36 : vector<16x1xf32>
      %38 = vector.broadcast %28 : vector<16x1xf32> to vector<16x32xf32>
      %39 = arith.subf %24, %38 : vector<16x32xf32>
      %cst_23 = arith.constant 9.99999996E-13 : f32
      %40 = vector.broadcast %cst_23 : f32 to vector<16x1xf32>
      %41 = arith.addf %37, %40 : vector<16x1xf32>
      %42 = math.rsqrt %41 : vector<16x1xf32>
      %43 = vector.broadcast %42 : vector<16x1xf32> to vector<16x32xf32>
      %44 = arith.mulf %39, %43 : vector<16x32xf32>
      %c0_24 = arith.constant 0 : index
      %c0_25 = arith.constant 0 : index
      %45 = vector.load %arg5[%c0_24, %c0_25] : memref<1x32xf32, #tpu.memory_space<vmem>>, vector<1x32xf32>
      %46 = vector.broadcast %45 : vector<1x32xf32> to vector<16x32xf32>
      %47 = arith.mulf %44, %46 : vector<16x32xf32>
      %c0_26 = arith.constant 0 : index
      %c0_27 = arith.constant 0 : index
      %48 = vector.load %arg6[%c0_26, %c0_27] : memref<1x32xf32, #tpu.memory_space<vmem>>, vector<1x32xf32>
      %49 = vector.broadcast %48 : vector<1x32xf32> to vector<16x32xf32>
      %50 = arith.addf %47, %49 : vector<16x32xf32>
      %51 = arith.truncf %50 : vector<16x32xf32> to vector<16x32xbf16>
      %c0_28 = arith.constant 0 : index
      %c0_29 = arith.constant 0 : index
      %52 = vector.load %arg7[%c0_28, %c0_29] : memref<32x16xbf16, #tpu.memory_space<vmem>>, vector<32x16xbf16>
      %cst_30 = arith.constant dense<0.000000e+00> : vector<16x16xf32>
      %53 = tpu.matmul %51, %52, %cst_30 {dimension_numbers = #tpu.dot_dimension_numbers<[1], [0], [0], [1], [0, 0, 1, 1], [], []>} : vector<16x32xbf16>, vector<32x16xbf16>, vector<16x16xf32> -> vector<16x16xf32>
      %54 = arith.truncf %53 : vector<16x16xf32> to vector<16x16xbf16>
      %c0_31 = arith.constant 0 : index
      %c0_32 = arith.constant 0 : index
      %55 = vector.load %arg11[%c0_31, %c0_32] : memref<16x16xbf16, #tpu.memory_space<vmem>>, vector<16x16xbf16>
      tpu.vector_store %arg11[%c0_31, %c0_32], %54 {strides = array<i32>} : memref<16x16xbf16, #tpu.memory_space<vmem>>, vector<16x16xbf16>,
    } else {
    }
    %c0 = arith.constant 0 : index
    %c0_1 = arith.constant 0 : index
    %3 = vector.load %arg11[%c0, %c0_1] : memref<16x16xbf16, #tpu.memory_space<vmem>>, vector<16x16xbf16>
    %c0_2 = arith.constant 0 : index
    %c0_3 = arith.constant 0 : index
    %4 = vector.load %arg8[%c0_2, %c0_3] : memref<128x16xbf16, #tpu.memory_space<vmem>>, vector<128x16xbf16>
    %cst = arith.constant dense<0.000000e+00> : vector<16x128xf32>
    %5 = tpu.matmul %3, %4, %cst {dimension_numbers = #tpu.dot_dimension_numbers<[1], [1], [0], [0], [0, 0, 1, 0], [], []>} : vector<16x16xbf16>, vector<128x16xbf16>, vector<16x128xf32> -> vector<16x128xf32>
    %c0_4 = arith.constant 0 : index
    %c0_5 = arith.constant 0 : index
    %6 = vector.load %arg9[%c0_4, %c0_5] : memref<1x128xf32, #tpu.memory_space<vmem>>, vector<1x128xf32>
    %7 = vector.broadcast %6 : vector<1x128xf32> to vector<16x128xf32>
    %8 = arith.addf %5, %7 : vector<16x128xf32>
    %c0_6 = arith.constant 0 : index
    %c0_7 = arith.constant 0 : index
    %9 = vector.load %arg10[%c0_6, %c0_7] : memref<16x128xf32, #tpu.memory_space<vmem>>, vector<16x128xf32>
    tpu.vector_store %arg10[%c0_6, %c0_7], %8 {strides = array<i32>} : memref<16x128xf32, #tpu.memory_space<vmem>>, vector<16x128xf32>,
    return
  }
  func.func @transform_0(%arg0: i32, %arg1: i32) -> (i32, i32) {
    %c0_i32 = arith.constant 0 : i32
    %c0_i32_0 = arith.constant 0 : i32
    return %arg0, %c0_i32 : i32, i32
  }
  func.func @transform_1(%arg0: i32, %arg1: i32) -> (i32, i32) {
    %c0_i32 = arith.constant 0 : i32
    %c0_i32_0 = arith.constant 0 : i32
    %c0_i32_1 = arith.constant 0 : i32
    return %c0_i32, %c0_i32_0 : i32, i32
  }
  func.func @transform_2(%arg0: i32, %arg1: i32) -> (i32, i32) {
    %c0_i32 = arith.constant 0 : i32
    %c0_i32_0 = arith.constant 0 : i32
    %c0_i32_1 = arith.constant 0 : i32
    return %c0_i32, %c0_i32_0 : i32, i32
  }
  func.func @transform_3(%arg0: i32, %arg1: i32) -> (i32, i32) {
    %c0_i32 = arith.constant 0 : i32
    %c0_i32_0 = arith.constant 0 : i32
    %c0_i32_1 = arith.constant 0 : i32
    return %c0_i32, %c0_i32_0 : i32, i32
  }
  func.func @transform_4(%arg0: i32, %arg1: i32) -> (i32, i32) {
    %c0_i32 = arith.constant 0 : i32
    %c0_i32_0 = arith.constant 0 : i32
    %c0_i32_1 = arith.constant 0 : i32
    return %c0_i32, %c0_i32_0 : i32, i32
  }
  func.func @transform_5(%arg0: i32, %arg1: i32) -> (i32, i32) {
    %c0_i32 = arith.constant 0 : i32
    %c0_i32_0 = arith.constant 0 : i32
    %c0_i32_1 = arith.constant 0 : i32
    return %c0_i32, %c0_i32_0 : i32, i32
  }
  func.func @transform_6(%arg0: i32, %arg1: i32) -> (i32, i32) {
    %c0_i32 = arith.constant 0 : i32
    %c0_i32_0 = arith.constant 0 : i32
    return %arg1, %c0_i32 : i32, i32
  }
  func.func @transform_7(%arg0: i32, %arg1: i32) -> (i32, i32) {
    %c0_i32 = arith.constant 0 : i32
    %c0_i32_0 = arith.constant 0 : i32
    return %c0_i32, %arg1 : i32, i32
  }
  func.func @transform_8(%arg0: i32, %arg1: i32) -> (i32, i32) {
    %c0_i32 = arith.constant 0 : i32
    return %arg0, %arg1 : i32, i32
  }
}

</mosaic_0001>

<bundles_post_ra>
// kernel: tpu_custom_call.1
= control target key start
LH: loop header
LB: loop body
LE: loop exit
PB: predicated region body
PF: predicated region fallthrough
CT: control target
= control target key end

     0   :  { %vm56_vm0 = vcmask 261120   ;;  %s667_s0 = inlined_call_operand.vmem [shape: f32[16,32], index: 0, kind: input, shape index: {}]   ;;  %s668_s1 = inlined_call_operand.vmem [shape: bf16[32,32], index: 1, kind: input, shape index: {}]   ;;  %s669_s2 = inlined_call_operand.vmem [shape: f32[1,32], index: 2, kind: input, shape index: {}]   ;;  %s670_s3 = inlined_call_operand.vmem [shape: f32[1,32], index: 3, kind: input, shape index: {}]   ;;  %s671_s4 = inlined_call_operand.vmem [shape: f32[1,32], index: 4, kind: input, shape index: {}]   ;;  %s672_s5 = inlined_call_operand.vmem [shape: bf16[32,16], index: 5, kind: input, shape index: {}]   ;;  %s673_s6 = inlined_call_operand.vmem [shape: bf16[128,16], index: 6, kind: input, shape index: {}]   ;;  %s674_s7 = inlined_call_operand.vmem [shape: f32[1,128], index: 7, kind: input, shape index: {}]   ;;  %s675_s8 = inlined_call_operand.hbm [shape: f32[16,128], index: 8, kind: output, shape index: {}]  }
   0x1   :  { %v463_v0 = vld [vmem:[%s668_s1 + $0x8] sm:$0xff] }
   0x2   :  { %v64_v1 = vsel %vm56_vm0, %v463_v0, 0 }
   0x3   :  { %72 = vmatpush.bf16.xpose.msra.mxu0 %v64_v1 }
   0x4   :  { %13 = vsyncpa [#allocation4], 0  ;;  %v462_v2 = vld [vmem:[%s668_s1] sm:$0xff]  ;;  %v36_v5 = vld [vmem:[%s667_s0 + $0x8] sm:$0xff]  ;;  %vm343_vm10 = vcmask 130048   ;;  %s393_s1 = sshll.u32 %s675_s8, 4  ;;  %s394_s1 = int_to_ptr.hbm [resolvable:$true] %s393_s1 }
   0x5   :  { %v61_v3 = vsel %vm56_vm0, %v462_v2, 0  ;;  %v35_v4 = vld [vmem:[%s667_s0] sm:$0xff]  ;;  %s522_s15 = smov 8  }
   0x6   :  { %v37_v6 = vpack.c.bf16 %v36_v5, %v35_v4  ;;  %v479_v7 = vld [vmem:[%s669_s2] ss:$0 sm:$0xff]  ;;  %s521_s2 = smov 128  }
   0xb   :  { %73 = vmatpush.bf16.xpose.msra.mxu0 %v61_v3 }
  0x12   :  { %413 = vmatmul.msk.bf16.vlgmr.msra.gmra.mxu0 %vm56_vm0, %v37_v6 }
  0x8f   :  { %v75_v8 = vpop.f32.mrf.mxu0 }
  0x90   :  { %v586_v9 = vadd.f32 %v479_v7, %v75_v8 }
  0x92   :  { %v82_v10 = vmul.f32 0.70710677, %v586_v9 }
  0x94   :  { %v84_v11 = vmul.f32 %v82_v10, %v82_v10 }
  0x96   :  { %v85_v12 = vmin.f32 %v84_v11, 16.0 }
  0x97   :  { %v77_v13 = vpop.f32.mrf.mxu0 }
  0x98   :  { %v86_v14 = vmul.f32 2.1237322e-06, %v85_v12  ;;  %v97_v15 = vmul.f32 3.8918573e-05, %v85_v12  ;;  %v589_v16 = vadd.f32 %v479_v7, %v77_v13 }
  0x9a   :  { %v87_v17 = vadd.f32 0.00028619796, %v86_v14  ;;  %v98_v18 = vadd.f32 0.001143296, %v97_v15  ;;  %v592_v19 = vmul.f32 0.70710677, %v589_v16 }
  0x9b   :  { %v80_v15 = vmul.f32 0.5, %v586_v9 }
  0x9c   :  { %v88_v20 = vmul.f32 %v87_v17, %v85_v12  ;;  %v99_v21 = vmul.f32 %v98_v18, %v85_v12  ;;  %v124_v22 = vmul.f32 %v592_v19, %v592_v19 }
  0x9e   :  { %v100_v23 = vadd.f32 0.014752088, %v99_v21  ;;  %v89_v24 = vadd.f32 0.0036580483, %v88_v20  ;;  %v125_v25 = vmin.f32 %v124_v22, 16.0 }
  0xa0   :  { %v101_v26 = vmul.f32 %v100_v23, %v85_v12  ;;  %v126_v27 = vmul.f32 2.1237322e-06, %v125_v25  ;;  %v137_v28 = vmul.f32 3.8918573e-05, %v125_v25  ;;  %v90_v30 = vmul.f32 %v89_v24, %v85_v12 }
  0xa2   :  { %v102_v29 = vadd.f32 0.112945676, %v101_v26  ;;  %v127_v31 = vadd.f32 0.00028619796, %v126_v27  ;;  %v138_v32 = vadd.f32 0.001143296, %v137_v28 }
  0xa3   :  { %v91_v37 = vadd.f32 0.05243302, %v90_v30  ;;  %v81_v28 = vmul.f32 0.5, %v589_v16 }
  0xa4   :  { %v103_v33 = vmul.f32 %v102_v29, %v85_v12  ;;  %v128_v34 = vmul.f32 %v127_v31, %v125_v25  ;;  %v139_v35 = vmul.f32 %v138_v32, %v125_v25 }
  0xa5   :  { %v92_v43 = vmul.f32 %v91_v37, %v85_v12 }
  0xa6   :  { %v104_v36 = vadd.f32 0.4994258, %v103_v33  ;;  %v140_v38 = vadd.f32 0.014752088, %v139_v35  ;;  %v129_v40 = vadd.f32 0.0036580483, %v128_v34 }
  0xa7   :  { %v93_v47 = vadd.f32 0.18741608, %v92_v43  ;;  %v519_v33 = vmov 32.0  }
  0xa8   :  { %v105_v39 = vmul.f32 %v104_v36, %v85_v12  ;;  %v141_v41 = vmul.f32 %v140_v38, %v125_v25  ;;  %v130_v45 = vmul.f32 %v129_v40, %v125_v25 }
  0xa9   :  { %v94_v52 = vmul.f32 %v93_v47, %v85_v12 }
  0xaa   :  { %v106_v42 = vadd.f32 1.0, %v105_v39  ;;  %v142_v44 = vadd.f32 0.112945676, %v141_v41  ;;  %v131_v49 = vadd.f32 0.05243302, %v130_v45 }
  0xab   :  { %v95_v58 = vadd.f32 1.1283791, %v94_v52 }
  0xac   :  { %483 = vrcp.f32 %v106_v42  ;;  %v143_v46 = vmul.f32 %v142_v44, %v125_v25  ;;  %v132_v55 = vmul.f32 %v131_v49, %v125_v25  ;;  %v118_v57 = vand.u32 2147483648, %v106_v42  ;;  %v465_v44 = vld [vmem:[%s672_s5 + $0x8] sm:$0xff] }
  0xad   :  { %v116_v60 = vand.u32 2147483647, %v106_v42  ;;  %vm112_vm2 = vweird.f32 %v106_v42  ;;  %v96_v1 = vmul.f32 %v95_v58, %v82_v10  ;;  %263 = vmatpush.bf16.msra.mxu1 %v465_v44 }
  0xae   :  { %v144_v48 = vadd.f32 0.4994258, %v143_v46  ;;  %v133_v61 = vadd.f32 0.18741608, %v132_v55  ;;  %v119_v63 = vor.u32 1.1754944e-38, %v118_v57  ;;  %v464_v46 = vld [vmem:[%s672_s5] sm:$0xff] }
  0xaf   :  { %vm117_vm4 = vcmp.eq.f32.partialorder %v116_v60, 8.507059e+37  ;;  %v474_v55 = vld [vmem:[%s673_s6 + $0x38] sm:$0xff] }
  0xb0   :  { %v145_v50 = vmul.f32 %v144_v48, %v125_v25  ;;  %v134_v4 = vmul.f32 %v133_v61, %v125_v25  ;;  %v369_v57 = vsel %vm343_vm10, %v474_v55, 0  ;;  %v473_v61 = vld [vmem:[%s673_s6 + $0x30] sm:$0xff] }
  0xb1   :  { %264 = vmatpush.bf16.msra.mxu1 %v464_v46  ;;  %371 = vmatpush.bf16.xpose.msra.mxu2 %v369_v57 }
  0xb2   :  { %v484_v51 = vpop.eup %483  ;;  %v146_v54 = vadd.f32 1.0, %v145_v50  ;;  %v135_v12 = vadd.f32 1.1283791, %v134_v4 }
  0xb3   :  { %v108_v53 = vmul.f32 %v484_v51, %v106_v42  ;;  %vm113_vm1 = vweird.f32 %v484_v51 }
  0xb4   :  { %485 = vrcp.f32 %v146_v54  ;;  %vm114_vm3 = vmor %vm112_vm2, %vm113_vm1  ;;  %v158_v8 = vand.u32 2147483648, %v146_v54  ;;  %v156_v14 = vand.u32 2147483647, %v146_v54  ;;  %vm152_vm6 = vweird.f32 %v146_v54 }
  0xb5   :  { %v109_v56 = vsub.f32 1.0, %v108_v53  ;;  %v136_v21 = vmul.f32 %v135_v12, %v592_v19  ;;  %487 = vrcp.f32 %v519_v33  ;;  %v467_v33 = vld [vmem:[%s673_s6] sm:$0xff] }
  0xb6   :  { %v159_v10 = vor.u32 1.1754944e-38, %v158_v8  ;;  %vm157_vm8 = vcmp.eq.f32.partialorder %v156_v14, 8.507059e+37 }
  0xb7   :  { %v110_v59 = vmul.f32 %v484_v51, %v109_v56 }
  0xb9   :  { %v111_v62 = vadd.f32 %v484_v51, %v110_v59 }
  0xba   :  { %v486_v0 = vpop.eup %485 }
  0xbb   :  { %v115_v2 = vsel %vm114_vm3, %v484_v51, %v111_v62  ;;  %v148_v5 = vmul.f32 %v486_v0, %v146_v54  ;;  %vm153_vm5 = vweird.f32 %v486_v0  ;;  %v488_v34 = vpop.eup %487 }
  0xbc   :  { %v120_v3 = vsel %vm117_vm4, %v119_v63, %v115_v2  ;;  %vm154_vm7 = vmor %vm152_vm6, %vm153_vm5  ;;  %v175_v35 = vmul.f32 32.0, %v488_v34  ;;  %vm179_vm9 = vweird.f32 %v488_v34 }
  0xbd   :  { %v121_v6 = vmul.f32 %v120_v3, %v96_v1  ;;  %v149_v7 = vsub.f32 1.0, %v148_v5  ;;  %v472_v3 = vld [vmem:[%s673_s6 + $0x28] sm:$0xff] }
  0xbe   :  { %v176_v36 = vsub.f32 1.0, %v175_v35 }
  0xbf   :  { %v414_v11 = vclamps-f32 %v121_v6, 1.0  ;;  %v150_v13 = vmul.f32 %v486_v0, %v149_v7  ;;  %v363_v7 = vsel %vm343_vm10, %v472_v3, 0 }
  0xc0   :  { %v177_v37 = vmul.f32 %v488_v34, %v176_v36 }
  0xc1   :  { %v164_v17 = vadd.f32 1.0, %v414_v11  ;;  %v151_v18 = vadd.f32 %v486_v0, %v150_v13 }
  0xc2   :  { %v178_v16 = vadd.f32 %v488_v34, %v177_v37 }
  0xc3   :  { %v597_v20 = vmul.f32 %v164_v17, %v80_v15  ;;  %v155_v22 = vsel %vm154_vm7, %v486_v0, %v151_v18  ;;  %v366_v0 = vsel %vm343_vm10, %v473_v61, 0  ;;  %v480_v15 = vld [vmem:[%s670_s3] ss:$0 sm:$0xff] }
  0xc4   :  { %v160_v23 = vsel %vm157_vm8, %v159_v10, %v155_v22  ;;  %v180_v38 = vsel %vm179_vm9, %v488_v34, %v178_v16  ;;  %372 = vmatpush.bf16.xpose.msra.mxu2 %v366_v0  ;;  %v471_v17 = vld [vmem:[%s673_s6 + $0x20] sm:$0xff]  ;;  %v348_v34 = vsel %vm343_vm10, %v467_v33, 0 }
  0xc5   :  { %v168_v24 = vsel %vm56_vm0, %v597_v20, 0.0  ;;  %v183_v25 = vmul.f32 %v597_v20, %v597_v20  ;;  %v161_v26 = vmul.f32 %v160_v23, %v136_v21  ;;  %v481_v23 = vld [vmem:[%s671_s4] ss:$0 sm:$0xff] }
  0xc6   :  { %169 = vadd.xlane.f32.xlu0 %v168_v24  ;;  %v360_v24 = vsel %vm343_vm10, %v471_v17, 0 }
  0xc7   :  { %v185_v9 = vsel %vm56_vm0, %v183_v25, 0.0  ;;  %v415_v27 = vclamps-f32 %v161_v26, 1.0 }
  0xc8   :  { %186 = vadd.xlane.f32.xlu1 %v185_v9 }
  0xc9   :  { %v165_v29 = vadd.f32 1.0, %v415_v27  ;;  %v470_v27 = vld [vmem:[%s673_s6 + $0x18] sm:$0xff] }
  0xcb   :  { %v606_v30 = vmul.f32 %v165_v29, %v81_v28  ;;  %v357_v29 = vsel %vm343_vm10, %v470_v27, 0 }
  0xcc   :  { %373 = vmatpush.bf16.xpose.msra.mxu2 %v363_v7 }
  0xcd   :  { %v171_v19 = vsel %vm56_vm0, %v606_v30, 0.0  ;;  %v184_v31 = vmul.f32 %v606_v30, %v606_v30 }
  0xce   :  { %172 = vadd.xlane.f32.xlu0 %v171_v19 }
  0xcf   :  { %v188_v32 = vsel %vm56_vm0, %v184_v31, 0.0  ;;  %v468_v31 = vld [vmem:[%s673_s6 + $0x8] sm:$0xff] }
  0xd0   :  { %189 = vadd.xlane.f32.xlu1 %v188_v32  ;;  %v351_v32 = vsel %vm343_vm10, %v468_v31, 0 }
  0xd4   :  { %374 = vmatpush.bf16.xpose.msra.mxu2 %v360_v24 }
  0xdc   :  { %375 = vmatpush.bf16.xpose.msra.mxu2 %v357_v29 }
 0x139   :  { %v170_v39 = vpop.xlane.xlu0 %169 }
 0x13a   :  { %v181_v40 = vmul.f32 %v180_v38, %v170_v39  ;;  %v482_v39 = vld [vmem:[%s674_s7] ss:$0 sm:$0xff] }
 0x13b   :  { %v187_v41 = vpop.xlane.xlu1 %186 }
 0x13c   :  { %v193_v42 = vmul.f32 %v181_v40, %v181_v40  ;;  %v191_v43 = vmul.f32 %v187_v41, %v180_v38  ;;  %v199_v12 = vsub.f32 %v597_v20, %v181_v40 }
 0x13e   :  { %v195_v45 = vsub.f32 %v191_v43, %v193_v42 }
 0x140   :  { %v197_v47 = vmax.f32 %v195_v45, 0.0 }
 0x141   :  { %v173_v49 = vpop.xlane.xlu0 %172 }
 0x142   :  { %v201_v48 = vadd.f32 1e-12, %v197_v47  ;;  %v182_v50 = vmul.f32 %v180_v38, %v173_v49 }
 0x143   :  { %v190_v51 = vpop.xlane.xlu1 %189 }
 0x144   :  { %489 = vrsqrt.f32 %v201_v48  ;;  %v194_v52 = vmul.f32 %v182_v50, %v182_v50  ;;  %v192_v53 = vmul.f32 %v190_v51, %v180_v38  ;;  %vm209_vm12 = vweird.f32 %v201_v48 }
 0x145   :  { %v200_v10 = vsub.f32 %v606_v30, %v182_v50  ;;  %v469_v30 = vld [vmem:[%s673_s6 + $0x10] sm:$0xff]  ;;  %s520_s6 = smov [#allocation3]  }
 0x146   :  { %v196_v54 = vsub.f32 %v192_v53, %v194_v52  ;;  %v354_v19 = vsel %vm343_vm10, %v469_v30, 0  ;;  %s391_s13 = sshll.u32 %s520_s6, 4  ;;  %s392_s13 = int_to_ptr.vmem [resolvable:$true] %s391_s13 }
 0x147   :  { %376 = vmatpush.bf16.xpose.msra.mxu2 %v354_v19 }
 0x148   :  { %v198_v56 = vmax.f32 %v196_v54, 0.0 }
 0x14a   :  { %v490_v58 = vpop.eup %489  ;;  %v202_v60 = vadd.f32 1e-12, %v198_v56 }
 0x14b   :  { %v204_v59 = vmul.f32 %v490_v58, %v201_v48  ;;  %vm210_vm11 = vweird.f32 %v490_v58 }
 0x14c   :  { %491 = vrsqrt.f32 %v202_v60  ;;  %vm211_vm13 = vmor %vm209_vm12, %vm210_vm11  ;;  %vm219_vm15 = vweird.f32 %v202_v60 }
 0x14d   :  { %v205_v62 = vmul.f32 %v490_v58, %v204_v59 }
 0x14f   :  { %v206_v63 = vmul.f32 0.5, %v205_v62  ;;  %377 = vmatpush.bf16.xpose.msra.mxu2 %v351_v32 }
 0x151   :  { %v207_v1 = vsub.f32 1.5, %v206_v63 }
 0x152   :  { %v492_v2 = vpop.eup %491 }
 0x153   :  { %v208_v4 = vmul.f32 %v490_v58, %v207_v1  ;;  %v214_v5 = vmul.f32 %v492_v2, %v202_v60  ;;  %vm220_vm14 = vweird.f32 %v492_v2 }
 0x154   :  { %vm221_vm1 = vmor %vm219_vm15, %vm220_vm14 }
 0x155   :  { %v215_v6 = vmul.f32 %v492_v2, %v214_v5  ;;  %v212_v11 = vsel %vm211_vm13, %v490_v58, %v208_v4 }
 0x156   :  { %v223_v14 = vmul.f32 %v212_v11, %v199_v12 }
 0x157   :  { %v216_v8 = vmul.f32 0.5, %v215_v6  ;;  %378 = vmatpush.bf16.xpose.msra.mxu2 %v348_v34 }
 0x158   :  { %v229_v20 = vmul.f32 %v480_v15, %v223_v14 }
 0x159   :  { %v217_v13 = vsub.f32 1.5, %v216_v8 }
 0x15a   :  { %v235_v26 = vadd.f32 %v481_v23, %v229_v20 }
 0x15b   :  { %v218_v18 = vmul.f32 %v492_v2, %v217_v13 }
 0x15d   :  { %v222_v21 = vsel %vm221_vm1, %v492_v2, %v218_v18 }
 0x15e   :  { %v224_v22 = vmul.f32 %v222_v21, %v200_v10 }
 0x160   :  { %v230_v25 = vmul.f32 %v480_v15, %v224_v22 }
 0x162   :  { %v236_v9 = vadd.f32 %v481_v23, %v230_v25 }
 0x164   :  { %v237_v28 = vpack.c.bf16 %v236_v9, %v235_v26 }
 0x166   :  { %424 = vmatmul.msk.bf16.vlgmr.msra.gmra.mxu1 %vm56_vm0, %v237_v28  ;;  %vm273_vm0 = vcmask 125952  }
 0x1e3   :  { %v266_v35 = vpop.f32.mrf.mxu1 }
 0x1e4   :  { %v271_v36 = vpack.c.bf16 %v266_v35, %v266_v35 }
 0x1e6   :  { %274 = vst.msk [vmem:[#allocation2] sm:$0xf] %vm273_vm0, %v271_v36 }
 0x1eb   :  { %v268_v37 = vpop.f32.mrf.mxu1 }
 0x1ec   :  { %v272_v16 = vpack.c.bf16 %v268_v37, %v268_v37 }
 0x1ee   :  { %275 = vst.msk [vmem:[#allocation2 + $0x4] sm:$0xf] %vm273_vm0, %v272_v16 }
 0x1f5   :  { %v466_v38 = vld [vmem:[#allocation2] sm:$0xff] }
 0x1f6   :  { %461 = vmatmul.msk.bf16.vlgmr.msra.gmra.mxu2 %vm343_vm10, %v466_v38 }
 0x279   :  { %v380_v40 = vpop.f32.mrf.mxu2 }
 0x27a   :  { %v381_v41 = vadd.f32 %v482_v39, %v380_v40 }
 0x27c   :  { %385 = vst [vmem:[#allocation3] sm:$0xff] %v381_v41 }
 0x281   :  { %v382_v42 = vpop.f32.mrf.mxu2 }
 0x282   :  { %v383_v43 = vadd.f32 %v482_v39, %v382_v42 }
 0x284   :  { %386 = vst [vmem:[#allocation3 + $0x8] sm:$0xff] %v383_v43 }
 0x285   :  { %399 = dma.vmem_to_hbm [thread:$0]  %s392_s13, 256, %s394_s1, [#allocation4], %s521_s2, %s521_s2, %s522_s15  }
 0x286   :  { %517 = dma.done.wait [#allocation4], 256  }
 0x287   :  { %518 = vsyncadd [#allocation4], 4294967040 }
 0x288   :  { %404 = vsyncpa [#allocation4], 1 }

</bundles_post_ra>
